<compile_context>
chip_gen: v5e
topology: v5e:2x2
jax: 0.10.0
libtpu: 0.0.40
codegen_flags: <defaults>
</compile_context>

<pallas_src>
import functools

import jax
import jax.numpy as jnp
import numpy as np
from jax.experimental import pallas as pl
from jax.experimental.pallas import tpu as pltpu

EPS_BN = 1e-5


# ----------------------------------------------------------------------------
# Fused kernel:  Linear(+folded BN) -> ReLU -> Linear(+folded BN)
# ----------------------------------------------------------------------------
def _posemb_kernel(x_ref, w1_ref, w2_ref, bias_ref, o_ref):
    x = x_ref[...]                                                     # [tm, pos_ind]
    h = jnp.dot(x, w1_ref[...], preferred_element_type=jnp.float32)   # [tm, p_hs]
    h = h + bias_ref[0:1, :]                                           # folded conv-bias + BN shift
    h = jnp.maximum(h, 0.0)                                            # ReLU (Dropout = identity, eval)
    o = jnp.dot(h, w2_ref[...], preferred_element_type=jnp.float32)   # [tm, p_hs]
    o = o + bias_ref[1:2, :]
    o_ref[...] = o.astype(o_ref.dtype)


def pos_emb_forward(pos, fparams, *, tm=None):
    """pos: [N, pos_ind] float32 -> [N, p_hs] float32."""
    N, pos_ind = pos.shape
    p_hs = fparams['w1'].shape[1]

    # Row tiling: single full block at small N (fewest grid steps), 512-row
    # tiles (multiple of 8 sublanes) once N gets large enough to matter.
    if tm is None:
        tm = N if N <= 512 else 512
    n_pad = pl.cdiv(N, tm) * tm
    if n_pad != N:
        pos = jnp.pad(pos, ((0, n_pad - N), (0, 0)))

    out = pl.pallas_call(
        _posemb_kernel,
        out_shape=jax.ShapeDtypeStruct((n_pad, p_hs), jnp.float32),
        grid=(n_pad // tm,),
        in_specs=[
            pl.BlockSpec((tm, pos_ind), lambda i: (i, 0)),      # pos rows
            pl.BlockSpec((pos_ind, p_hs), lambda i: (0, 0)),    # folded W1
            pl.BlockSpec((p_hs, p_hs), lambda i: (0, 0)),       # folded W2
            pl.BlockSpec((2, p_hs), lambda i: (0, 0)),          # packed folded biases
        ],
        out_specs=pl.BlockSpec((tm, p_hs), lambda i: (i, 0)),
        compiler_params=pltpu.CompilerParams(
            dimension_semantics=("parallel",)),                 # v7x: shard rows across 2 TCs
    )(pos, fparams['w1'], fparams['w2'], fparams['bias'])

    return out[:N] if n_pad != N else out


# ----------------------------------------------------------------------------
# Parameter construction (PyTorch-style init, nontrivial BN running stats)
# and host-side BN folding.
# ----------------------------------------------------------------------------
def init_posemb_params(key, pos_ind, p_hs):
    ks = iter(jax.random.split(key, 12))

    def conv1x1(din, dout):
        # nn.Conv1d(din, dout, 1): U(-1/sqrt(din), 1/sqrt(din)); stored as [din, dout]
        lim = float(din) ** -0.5
        w = jax.random.uniform(next(ks), (din, dout), jnp.float32, -lim, lim)
        b = jax.random.uniform(next(ks), (dout,), jnp.float32, -lim, lim)
        return w, b

    def bn(d):
        gamma = 1.0 + 0.1 * jax.random.normal(next(ks), (d,), jnp.float32)
        beta = 0.1 * jax.random.normal(next(ks), (d,), jnp.float32)
        rmean = 0.05 * jax.random.normal(next(ks), (d,), jnp.float32)
        rvar = jnp.abs(1.0 + 0.1 * jax.random.normal(next(ks), (d,), jnp.float32))
        return gamma, beta, rmean, rvar

    w1, b1 = conv1x1(pos_ind, p_hs)
    g1, be1, rm1, rv1 = bn(p_hs)
    w2, b2 = conv1x1(p_hs, p_hs)
    g2, be2, rm2, rv2 = bn(p_hs)
    return dict(w1=w1, b1=b1, g1=g1, be1=be1, rm1=rm1, rv1=rv1,
                w2=w2, b2=b2, g2=g2, be2=be2, rm2=rm2, rv2=rv2)


def fold_posemb_params(raw):
    """Fold eval-mode BatchNorm1d into the 1x1-conv weights (done once, host-side)."""
    def fold_layer(w, b, gamma, beta, mean, var):
        scale = gamma / jnp.sqrt(var + EPS_BN)                 # [dout]
        w_f = w * scale[None, :]                               # [din, dout]
        b_f = b * scale + (beta - mean * scale)                # [dout]
        return w_f, b_f

    w1f, b1f = fold_layer(raw['w1'], raw['b1'], raw['g1'], raw['be1'], raw['rm1'], raw['rv1'])
    w2f, b2f = fold_layer(raw['w2'], raw['b2'], raw['g2'], raw['be2'], raw['rm2'], raw['rv2'])
    return dict(w1=w1f, w2=w2f, bias=jnp.stack([b1f, b2f], axis=0))   # bias: [2, p_hs]


# ----------------------------------------------------------------------------
# Pure-JAX reference (mirrors the PyTorch forward exactly, unfolded params)
# ----------------------------------------------------------------------------
def posemb_reference(pos, raw):
    y = pos @ raw['w1'] + raw['b1'][None, :]
    y = (y - raw['rm1']) / jnp.sqrt(raw['rv1'] + EPS_BN) * raw['g1'] + raw['be1']
    y = jnp.maximum(y, 0.0)
    y = y @ raw['w2'] + raw['b2'][None, :]
    y = (y - raw['rm2']) / jnp.sqrt(raw['rv2'] + EPS_BN) * raw['g2'] + raw['be2']
    return y


if __name__ == "__main__":
    POS_IND, P_HS, N = 3, 16, 16

    root = jax.random.PRNGKey(0)
    kparam, kpos = jax.random.split(root)

    raw_params = init_posemb_params(kparam, POS_IND, P_HS)
    folded = fold_posemb_params(raw_params)
    pos = jax.random.normal(kpos, (N, POS_IND), jnp.float32)

    fwd = jax.jit(functools.partial(pos_emb_forward))
    out = fwd(pos, folded)
    jax.block_until_ready(out)

    ref = posemb_reference(pos, raw_params)
    np.testing.assert_allclose(np.asarray(out), np.asarray(ref), rtol=1e-4, atol=1e-4)

    print("KERNEL_OK")
</pallas_src>

<mosaic_0001>
module attributes {stable_mosaic.version = 11 : i64} {
  func.func @_posemb_kernel(%arg0: i32, %arg1: memref<16x3xf32, #tpu.memory_space<vmem>>, %arg2: memref<3x16xf32, #tpu.memory_space<vmem>>, %arg3: memref<16x16xf32, #tpu.memory_space<vmem>>, %arg4: memref<2x16xf32, #tpu.memory_space<vmem>>, %arg5: memref<16x16xf32, #tpu.memory_space<vmem>>) attributes {dimension_semantics = [#tpu.dimension_semantics<parallel>], iteration_bounds = array<i64: 1>, scalar_prefetch = 0 : i64, scratch_operands = 0 : i64, tpu.core_type = #tpu.core_type<tc>, window_params = [{transform_indices = @transform_0, window_bounds = array<i64: 16, 3>}, {pipeline_mode = #tpu.pipeline_mode<synchronous>, transform_indices = @transform_1, window_bounds = array<i64: 3, 16>}, {pipeline_mode = #tpu.pipeline_mode<synchronous>, transform_indices = @transform_2, window_bounds = array<i64: 16, 16>}, {pipeline_mode = #tpu.pipeline_mode<synchronous>, transform_indices = @transform_3, window_bounds = array<i64: 2, 16>}, {transform_indices = @transform_4, window_bounds = array<i64: 16, 16>}]} {
    %c0 = arith.constant 0 : index
    %c0_0 = arith.constant 0 : index
    %0 = vector.load %arg1[%c0, %c0_0] : memref<16x3xf32, #tpu.memory_space<vmem>>, vector<16x3xf32>
    %c0_1 = arith.constant 0 : index
    %c0_2 = arith.constant 0 : index
    %1 = vector.load %arg2[%c0_1, %c0_2] : memref<3x16xf32, #tpu.memory_space<vmem>>, vector<3x16xf32>
    %cst = arith.constant dense<0.000000e+00> : vector<16x16xf32>
    %2 = tpu.matmul %0, %1, %cst {dimension_numbers = #tpu.dot_dimension_numbers<[1], [0], [0], [1], [0, 0, 1, 1], [], []>} : vector<16x3xf32>, vector<3x16xf32>, vector<16x16xf32> -> vector<16x16xf32>
    %c0_3 = arith.constant 0 : index
    %c0_4 = arith.constant 0 : index
    %3 = vector.load %arg4[%c0_3, %c0_4] : memref<2x16xf32, #tpu.memory_space<vmem>>, vector<1x16xf32>
    %4 = vector.broadcast %3 : vector<1x16xf32> to vector<16x16xf32>
    %5 = arith.addf %2, %4 : vector<16x16xf32>
    %cst_5 = arith.constant 0.000000e+00 : f32
    %6 = vector.broadcast %cst_5 : f32 to vector<16x16xf32>
    %7 = arith.maximumf %5, %6 : vector<16x16xf32>
    %c0_6 = arith.constant 0 : index
    %c0_7 = arith.constant 0 : index
    %8 = vector.load %arg3[%c0_6, %c0_7] : memref<16x16xf32, #tpu.memory_space<vmem>>, vector<16x16xf32>
    %cst_8 = arith.constant dense<0.000000e+00> : vector<16x16xf32>
    %9 = tpu.matmul %7, %8, %cst_8 {dimension_numbers = #tpu.dot_dimension_numbers<[1], [0], [0], [1], [0, 0, 1, 1], [], []>} : vector<16x16xf32>, vector<16x16xf32>, vector<16x16xf32> -> vector<16x16xf32>
    %c1 = arith.constant 1 : index
    %c0_9 = arith.constant 0 : index
    %10 = vector.load %arg4[%c1, %c0_9] : memref<2x16xf32, #tpu.memory_space<vmem>>, vector<1x16xf32>
    %11 = vector.broadcast %10 : vector<1x16xf32> to vector<16x16xf32>
    %12 = arith.addf %9, %11 : vector<16x16xf32>
    %c0_10 = arith.constant 0 : index
    %c0_11 = arith.constant 0 : index
    %13 = vector.load %arg5[%c0_10, %c0_11] : memref<16x16xf32, #tpu.memory_space<vmem>>, vector<16x16xf32>
    tpu.vector_store %arg5[%c0_10, %c0_11], %12 {strides = array<i32>} : memref<16x16xf32, #tpu.memory_space<vmem>>, vector<16x16xf32>,
    return
  }
  func.func @transform_0(%arg0: i32) -> (i32, i32) {
    %c0_i32 = arith.constant 0 : i32
    %c0_i32_0 = arith.constant 0 : i32
    return %arg0, %c0_i32 : i32, i32
  }
  func.func @transform_1(%arg0: i32) -> (i32, i32) {
    %c0_i32 = arith.constant 0 : i32
    %c0_i32_0 = arith.constant 0 : i32
    %c0_i32_1 = arith.constant 0 : i32
    return %c0_i32, %c0_i32_0 : i32, i32
  }
  func.func @transform_2(%arg0: i32) -> (i32, i32) {
    %c0_i32 = arith.constant 0 : i32
    %c0_i32_0 = arith.constant 0 : i32
    %c0_i32_1 = arith.constant 0 : i32
    return %c0_i32, %c0_i32_0 : i32, i32
  }
  func.func @transform_3(%arg0: i32) -> (i32, i32) {
    %c0_i32 = arith.constant 0 : i32
    %c0_i32_0 = arith.constant 0 : i32
    %c0_i32_1 = arith.constant 0 : i32
    return %c0_i32, %c0_i32_0 : i32, i32
  }
  func.func @transform_4(%arg0: i32) -> (i32, i32) {
    %c0_i32 = arith.constant 0 : i32
    %c0_i32_0 = arith.constant 0 : i32
    return %arg0, %c0_i32 : i32, i32
  }
}

</mosaic_0001>

<bundles_post_ra>
// kernel: pos_emb_forward.1
= control target key start
LH: loop header
LB: loop body
LE: loop exit
PB: predicated region body
PF: predicated region fallthrough
CT: control target
= control target key end

     0   :  { %vm30_vm0 = vcmask 1042432   ;;  %vm23_vm1 = vcmask 23552   ;;  %s208_s0 = inlined_call_operand.vmem [shape: f32[16,3], index: 0, kind: input, shape index: {}]   ;;  %s209_s1 = inlined_call_operand.vmem [shape: f32[3,16], index: 1, kind: input, shape index: {}]   ;;  %s210_s2 = inlined_call_operand.vmem [shape: f32[16,16], index: 2, kind: input, shape index: {}]   ;;  %s211_s3 = inlined_call_operand.vmem [shape: f32[2,16], index: 3, kind: input, shape index: {}]   ;;  %s212_s4 = inlined_call_operand.hbm [shape: f32[16,16], index: 4, kind: output, shape index: {}]  }
   0x1   :  { %v20_v0 = vld [vmem:[%s209_s1] sm:$0x7]  ;;  %v19_v1 = vld [vmem:[%s208_s0 + $0x8] sm:$0xff] }
   0x2   :  { %v18_v2 = vld [vmem:[%s208_s0] sm:$0xff]  ;;  %118 = vmatpush.msk.msra.mxu3 %vm30_vm0, %v20_v0  ;;  %113 = vmatpush.msk.msra.mxu0 %vm30_vm0, %v20_v0 }
   0x3   :  { %115 = vmatmul.msk.f32.vlgmr.msra.gmra.mxu3 %vm23_vm1, %v19_v1  ;;  %114 = vmatmul.msk.f32.vlgmr.msra.gmra.mxu0 %vm23_vm1, %v18_v2 }
   0x4   :  { %9 = vsyncpa [#allocation3], 0  ;;  %v60_v3 = vld [vmem:[%s210_s2 + $0x8] sm:$0xff]  ;;  %v59_v4 = vld [vmem:[%s210_s2] sm:$0xff]  ;;  %vm63_vm2 = vcmask 130048   ;;  %s152_s2 = smov [#allocation2]  }
   0x5   :  { %119 = vmatpush.msra.mxu2 %v60_v3  ;;  %84 = vmatpush.msra.mxu1 %v60_v3  ;;  %v124_v5 = vld [vmem:[%s211_s3] ss:$0 sm:$0xff]  ;;  %v125_v12 = vld [vmem:[%s211_s3 + $0x1] ss:$0 sm:$0xff]  ;;  %s99_s27 = sshll.u32 %s152_s2, 4  ;;  %s101_s30 = sshll.u32 %s212_s4, 4  ;;  %s100_s27 = int_to_ptr.vmem [resolvable:$true] %s99_s27  ;;  %s102_s30 = int_to_ptr.hbm [resolvable:$true] %s101_s30 }
   0x6   :  { %s153_s5 = smov 128   ;;  %s154_s6 = smov 8  }
   0x7   :  { %120 = vmatpush.msra.mxu2 %v59_v4  ;;  %85 = vmatpush.msra.mxu1 %v59_v4 }
  0x80   :  { %v51_v6 = vpop.f32.mrf.mxu0 }
  0x81   :  { %v52_v7 = vadd.f32 %v124_v5, %v51_v6 }
  0x83   :  { %v57_v8 = vmax.f32 %v52_v7, 0.0 }
  0x85   :  { %116 = vmatmul.msk.f32.vlgmr.msra.gmra.mxu1 %vm63_vm2, %v57_v8 }
  0x86   :  { %v54_v9 = vpop.f32.mrf.mxu3 }
  0x87   :  { %v55_v10 = vadd.f32 %v124_v5, %v54_v9 }
  0x89   :  { %v58_v11 = vmax.f32 %v55_v10, 0.0 }
  0x8b   :  { %117 = vmatmul.msk.f32.vlgmr.msra.gmra.mxu2 %vm63_vm2, %v58_v11 }
 0x102   :  { %v87_v13 = vpop.f32.mrf.mxu1 }
 0x103   :  { %v88_v14 = vadd.f32 %v125_v12, %v87_v13 }
 0x105   :  { %93 = vst.msk [vmem:[#allocation2] sm:$0xff] %vm63_vm2, %v88_v14 }
 0x10e   :  { %v90_v15 = vpop.f32.mrf.mxu2 }
 0x10f   :  { %v91_v16 = vadd.f32 %v125_v12, %v90_v15 }
 0x111   :  { %94 = vst.msk [vmem:[#allocation2 + $0x8] sm:$0xff] %vm63_vm2, %v91_v16 }
 0x112   :  { %107 = dma.vmem_to_hbm [thread:$0]  %s100_s27, 256, %s102_s30, [#allocation3], %s153_s5, %s153_s5, %s154_s6  }
 0x113   :  { %150 = dma.done.wait [#allocation3], 256  }
 0x114   :  { %151 = vsyncadd [#allocation3], 4294967040 }
 0x115   :  { %112 = vsyncpa [#allocation3], 1 }

</bundles_post_ra>
